<compile_context>
chip_gen: v7x
topology: tpu7x:2x2x1
jax: 0.10.0
libtpu: 0.0.40
codegen_flags: <defaults>
</compile_context>

<pallas_src>
import functools

import jax
import jax.numpy as jnp
from jax.experimental import pallas as pl
from jax.experimental.pallas import tpu as pltpu


def _leaky_relu(x, slope=0.2):
    return jnp.where(x > 0, x, slope * x)


def _round_up(x, m):
    return ((x + m - 1) // m) * m


def _cdiv(a, b):
    return -(-a // b)


def _num_tensorcores_per_chip():
    """v7x (and v4 megacore) expose 2 TensorCores per chip; v5e/v6e have 1."""
    try:
        kind = jax.devices()[0].device_kind.lower()
    except Exception:
        return 1
    return 2 if ("v7" in kind or "v4" in kind) else 1


_N_TC = _num_tensorcores_per_chip()


def _disc_kernel(
    xin_ref,    # (TB, F+C)     f32   concatenated [features, labels]
    wbd_ref,    # (F+C, H+Lp)   bf16  block-diag [[W1f, 0], [0, Wc_pad]]
    bin_ref,    # (1, H+Lp)     f32   [b1, bc_pad]
    w1c_ref,    # (Lp, H)       bf16
    w2_ref,     # (H, H)        bf16
    b2_ref,     # (1, H)        f32
    wo_ref,     # (1, H)        f32   (used on the VPU, not the MXU)
    bo_ref,     # (1, 1)        f32   SMEM scalar
    out_ref,    # (TB, 1)       f32
    *,
    hidden,
):
    H = hidden
    bf16 = jnp.bfloat16

    # Cast inputs on the VPU (free vs. the MXU); single K=(F+C) MXU pass
    # computes both the feature partial of layer 1 and the condition
    # pre-activation thanks to the block-diagonal weight.
    xin = xin_ref[...].astype(bf16)
    z = jnp.dot(xin, wbd_ref[...], preferred_element_type=jnp.float32)
    z = z + bin_ref[...]                       # (TB, H+Lp) f32

    # fc_condition: LeakyReLU(labels @ Wc + bc)   (lane-aligned slice at H=256)
    h_c = _leaky_relu(z[:, H:])                # (TB, Lp) f32, pad lanes are 0

    # net block 1: LeakyReLU(feats @ W1f + h_c @ W1c + b1)
    h1 = _leaky_relu(
        z[:, :H]
        + jnp.dot(h_c.astype(bf16), w1c_ref[...],
                  preferred_element_type=jnp.float32)
    )

    # net block 2: LeakyReLU(h1 @ W2 + b2)
    h2 = _leaky_relu(
        jnp.dot(h1.astype(bf16), w2_ref[...],
                preferred_element_type=jnp.float32)
        + b2_ref[...]
    )

    # output_head: Linear(256 -> 1) done as VPU multiply + cross-lane reduce
    # (width-1 matmul would waste the MXU).
    validity = jnp.sum(h2 * wo_ref[...], axis=-1, keepdims=True) + bo_ref[0, 0]
    out_ref[...] = validity.astype(out_ref.dtype)


def pack_params(params):
    """One-time weight packing (pad, bf16 cast, block-diag build).

    Hoisted out of the per-call path: at these sizes the per-call pad/cast
    fusions cost as much as the kernel itself.
    """
    wc, bc, w1f, w1c, b1, w2, b2, wo, bo = params
    C, L = wc.shape
    F, H = w1f.shape
    Lp = _round_up(L, 128)
    bf16 = jnp.bfloat16

    # Block-diagonal fused first-layer weight:
    #   [feats, labels] @ [[W1f, 0], [0, Wc_pad]] -> [feats@W1f, labels@Wc_pad]
    wbd = jnp.zeros((F + C, H + Lp), jnp.float32)
    wbd = wbd.at[:F, :H].set(w1f)
    wbd = wbd.at[F:, H:H + L].set(wc)
    wbd = wbd.astype(bf16)                                      # (F+C, H+Lp)

    bin_ = jnp.concatenate(
        [b1, jnp.pad(bc, ((0, 0), (0, Lp - L)))], axis=1
    ).astype(jnp.float32)                                       # (1, H+Lp)

    w1c_p = jnp.pad(w1c, ((0, Lp - L), (0, 0))).astype(bf16)    # (Lp, H)
    w2_b = w2.astype(bf16)                                      # (H, H)
    wo_row = wo.reshape(1, H).astype(jnp.float32)               # (1, H)
    bo_s = bo.reshape(1, 1).astype(jnp.float32)                 # (1, 1) SMEM
    b2_f = b2.astype(jnp.float32)                               # (1, H)
    return (wbd, bin_, w1c_p, w2_b, b2_f, wo_row, bo_s)


@functools.partial(jax.jit, static_argnames=("tile_b",))
def discriminator_with_condition(features, labels, packed, tile_b=2048):
    """features: [B, F] f32, labels: [B, C] f32 -> validity [B, 1] f32."""
    B, F = features.shape
    _, C = labels.shape
    wbd, bin_, w1c_p, w2_b, b2, wo_row, bo_s = packed
    K = F + C
    HLp = wbd.shape[1]
    Lp = w1c_p.shape[0]
    H = HLp - Lp

    # Single concatenated input: one 48-lane DMA stream, one K=48 MXU pass.
    xin = jnp.concatenate([features, labels], axis=-1)          # (B, F+C) f32

    # --- Tile sizing (static at trace time) -------------------------------
    # Even split (no 256-multiple cap -> no ~41% padded work at B=600).
    # 1-TC chips (v5e/v6e): one tile unless B exceeds tile_b.
    # multi-TC chips (v7x): >=2 tiles once B >= 256 so both cores get work.
    n_splits = _cdiv(B, tile_b)
    if _N_TC >= 2 and B >= 256:
        n_splits = max(n_splits, _N_TC)
    tb = _round_up(_cdiv(B, n_splits), 16)
    n_tiles = _cdiv(B, tb)
    # No wrapper-side batch pad: the ragged last tile's OOB rows are garbage
    # (row-local, all layers are row-wise independent) and the output store of
    # those rows is masked by Pallas.

    batch_map = lambda i: (i, 0)
    rep_map = lambda i: (0, 0)   # constant block index -> weights stay VMEM-resident

    weight_bytes = (
        wbd.size * 2 + w1c_p.size * 2 + w2_b.size * 2
        + (bin_.size + b2.size + wo_row.size + bo_s.size) * 4
    )
    cost = pl.CostEstimate(
        flops=2 * B * (K * HLp + Lp * H + H * H + H),
        transcendentals=0,
        bytes_accessed=B * K * 4 + weight_bytes + B * 4,
    )

    kernel = functools.partial(_disc_kernel, hidden=H)
    out = pl.pallas_call(
        kernel,
        out_shape=jax.ShapeDtypeStruct((B, 1), jnp.float32),
        grid=(n_tiles,),
        in_specs=[
            pl.BlockSpec((tb, K), batch_map),                    # xin (f32)
            pl.BlockSpec((K, HLp), rep_map),                     # W block-diag
            pl.BlockSpec((1, HLp), rep_map),                     # [b1, bc]
            pl.BlockSpec((Lp, H), rep_map),                      # W1c
            pl.BlockSpec((H, H), rep_map),                       # W2
            pl.BlockSpec((1, H), rep_map),                       # b2
            pl.BlockSpec((1, H), rep_map),                       # Wo (VPU)
            pl.BlockSpec(memory_space=pltpu.MemorySpace.SMEM),   # bo scalar
        ],
        out_specs=pl.BlockSpec((tb, 1), batch_map),
        compiler_params=pltpu.CompilerParams(
            dimension_semantics=("parallel",)
        ),
        cost_estimate=cost,
    )(xin, wbd, bin_, w1c_p, w2_b, b2, wo_row, bo_s)
    return out


def init_params(key, num_features, condition_size, condition_latent_dim=25, hidden=256):
    """Deterministic synthetic init. Weights stored [in, out] (pre-transposed)."""
    ks = jax.random.split(key, 8)
    F, C, L, H = num_features, condition_size, condition_latent_dim, hidden

    def lin(k, fan_in, shape):
        # uniform(-1/sqrt(fan_in), 1/sqrt(fan_in)), like torch.nn.Linear default
        bound = 1.0 / jnp.sqrt(jnp.float32(fan_in))
        return jax.random.uniform(k, shape, jnp.float32, -bound, bound)

    wc = lin(ks[0], C, (C, L))
    bc = lin(ks[1], C, (1, L))
    w1 = lin(ks[2], F + L, (F + L, H))
    w1f, w1c = w1[:F, :], w1[F:, :]
    b1 = lin(ks[3], F + L, (1, H))
    w2 = lin(ks[4], H, (H, H))
    b2 = lin(ks[5], H, (1, H))
    wo = lin(ks[6], H, (H, 1))
    bo = lin(ks[7], H, (1, 1))
    return (wc, bc, w1f, w1c, b1, w2, b2, wo, bo)


def _reference_f32(features, labels, params):
    """Module semantics in full f32 (the PyTorch forward)."""
    wc, bc, w1f, w1c, b1, w2, b2, wo, bo = params
    lrelu = lambda x: jnp.where(x > 0, x, 0.2 * x)
    h_c = lrelu(labels @ wc + bc)
    x = jnp.concatenate([features, h_c], axis=-1)
    w1 = jnp.concatenate([w1f, w1c], axis=0)
    h1 = lrelu(x @ w1 + b1)
    h2 = lrelu(h1 @ w2 + b2)
    return h2 @ wo + bo


def _reference_mixed(features, labels, params):
    """Mirrors the kernel's bf16-MXU / f32-accumulate scheme (tight check)."""
    wc, bc, w1f, w1c, b1, w2, b2, wo, bo = params
    lrelu = lambda x: jnp.where(x > 0, x, 0.2 * x)
    bf, f32 = jnp.bfloat16, jnp.float32
    fb, lb = features.astype(bf), labels.astype(bf)
    z_f = jnp.dot(fb, w1f.astype(bf), preferred_element_type=f32) + b1
    z_c = jnp.dot(lb, wc.astype(bf), preferred_element_type=f32) + bc
    h_c = lrelu(z_c)
    h1 = lrelu(z_f + jnp.dot(h_c.astype(bf), w1c.astype(bf),
                             preferred_element_type=f32))
    h2 = lrelu(jnp.dot(h1.astype(bf), w2.astype(bf),
                       preferred_element_type=f32) + b2)
    return jnp.sum(h2 * wo.reshape(1, -1), axis=-1, keepdims=True) + bo.reshape(1, 1)


if __name__ == "__main__":
    num_features = 32
    condition_size = 16
    condition_latent_dim = 25

    key = jax.random.PRNGKey(0)
    _, _, kp = jax.random.split(key, 3)
    params = init_params(kp, num_features, condition_size, condition_latent_dim)
    packed = pack_params(params)
    packed = jax.block_until_ready(packed)

    # B=8  : single partial tile (tb=16 > B), exercises ragged/masked-store path
    # B=600: single 608-row tile on v5e/v6e, 2x304 tiles on v7x
    # The extra tile_b=256 call exercises a multi-step grid + ragged last tile
    # on every chip generation.
    for B in (8, 600):
        kf_b, kl_b = jax.random.split(jax.random.fold_in(key, B))
        features = jax.random.normal(kf_b, (B, num_features), jnp.float32)
        labels = jax.random.normal(kl_b, (B, condition_size), jnp.float32)

        ref_mixed = _reference_mixed(features, labels, params)
        ref_f32 = _reference_f32(features, labels, params)

        for tb_arg in (2048, 256):
            validity = discriminator_with_condition(
                features, labels, packed, tile_b=tb_arg)
            validity = jax.block_until_ready(validity)
            assert validity.shape == (B, 1)

            assert jnp.allclose(validity, ref_mixed, atol=2e-3, rtol=2e-3), (
                f"B={B} tile_b={tb_arg}: max |diff| vs mixed ref "
                f"{jnp.max(jnp.abs(validity - ref_mixed))}"
            )
            # bf16 MXU inputs vs full-f32 module: loose tolerance by design.
            assert jnp.allclose(validity, ref_f32, atol=1e-1, rtol=1e-1), (
                f"B={B} tile_b={tb_arg}: max |diff| vs f32 ref "
                f"{jnp.max(jnp.abs(validity - ref_f32))}"
            )

    print("KERNEL_OK")
</pallas_src>

<mosaic_0001>
module attributes {stable_mosaic.version = 11 : i64} {
  func.func @_disc_kernel(%arg0: i32, %arg1: memref<16x48xf32, #tpu.memory_space<vmem>>, %arg2: memref<48x384xbf16, #tpu.memory_space<vmem>>, %arg3: memref<1x384xf32, #tpu.memory_space<vmem>>, %arg4: memref<128x256xbf16, #tpu.memory_space<vmem>>, %arg5: memref<256x256xbf16, #tpu.memory_space<vmem>>, %arg6: memref<1x256xf32, #tpu.memory_space<vmem>>, %arg7: memref<1x256xf32, #tpu.memory_space<vmem>>, %arg8: memref<1x1xf32, #tpu.memory_space<smem>>, %arg9: memref<16x1xf32, #tpu.memory_space<vmem>>) attributes {dimension_semantics = [#tpu.dimension_semantics<parallel>], iteration_bounds = array<i64: 1>, scalar_prefetch = 0 : i64, scratch_operands = 0 : i64, tpu.core_type = #tpu.core_type<tc>, window_params = [{transform_indices = @transform_0, window_bounds = array<i64: 16, 48>}, {pipeline_mode = #tpu.pipeline_mode<synchronous>, transform_indices = @transform_1, window_bounds = array<i64: 48, 384>}, {pipeline_mode = #tpu.pipeline_mode<synchronous>, transform_indices = @transform_2, window_bounds = array<i64: 1, 384>}, {pipeline_mode = #tpu.pipeline_mode<synchronous>, transform_indices = @transform_3, window_bounds = array<i64: 128, 256>}, {pipeline_mode = #tpu.pipeline_mode<synchronous>, transform_indices = @transform_4, window_bounds = array<i64: 256, 256>}, {pipeline_mode = #tpu.pipeline_mode<synchronous>, transform_indices = @transform_5, window_bounds = array<i64: 1, 256>}, {pipeline_mode = #tpu.pipeline_mode<synchronous>, transform_indices = @transform_6, window_bounds = array<i64: 1, 256>}, {transform_indices = @transform_7, window_bounds = array<i64: 1, 1>}, {transform_indices = @transform_8, window_bounds = array<i64: 16, 1>}]} {
    %c0 = arith.constant 0 : index
    %c0_0 = arith.constant 0 : index
    %0 = vector.load %arg1[%c0, %c0_0] : memref<16x48xf32, #tpu.memory_space<vmem>>, vector<16x48xf32>
    %1 = arith.truncf %0 : vector<16x48xf32> to vector<16x48xbf16>
    %c0_1 = arith.constant 0 : index
    %c0_2 = arith.constant 0 : index
    %2 = vector.load %arg2[%c0_1, %c0_2] : memref<48x384xbf16, #tpu.memory_space<vmem>>, vector<48x384xbf16>
    %cst = arith.constant dense<0.000000e+00> : vector<16x384xf32>
    %3 = tpu.matmul %1, %2, %cst {dimension_numbers = #tpu.dot_dimension_numbers<[1], [0], [0], [1], [0, 0, 1, 1], [], []>} : vector<16x48xbf16>, vector<48x384xbf16>, vector<16x384xf32> -> vector<16x384xf32>
    %c0_3 = arith.constant 0 : index
    %c0_4 = arith.constant 0 : index
    %4 = vector.load %arg3[%c0_3, %c0_4] : memref<1x384xf32, #tpu.memory_space<vmem>>, vector<1x384xf32>
    %5 = vector.broadcast %4 : vector<1x384xf32> to vector<16x384xf32>
    %6 = arith.addf %3, %5 : vector<16x384xf32>
    %7 = vector.extract_strided_slice %6 {offsets = [0, 256], sizes = [16, 128], strides = [1, 1]} : vector<16x384xf32> to vector<16x128xf32>
    %cst_5 = arith.constant 0.000000e+00 : f32
    %8 = vector.broadcast %cst_5 : f32 to vector<16x128xf32>
    %9 = arith.cmpf ogt, %7, %8 : vector<16x128xf32>
    %cst_6 = arith.constant 2.000000e-01 : f32
    %10 = vector.broadcast %cst_6 : f32 to vector<16x128xf32>
    %11 = arith.mulf %10, %7 : vector<16x128xf32>
    %12 = arith.select %9, %7, %11 : vector<16x128xi1>, vector<16x128xf32>
    %13 = vector.extract_strided_slice %6 {offsets = [0, 0], sizes = [16, 256], strides = [1, 1]} : vector<16x384xf32> to vector<16x256xf32>
    %14 = arith.truncf %12 : vector<16x128xf32> to vector<16x128xbf16>
    %c0_7 = arith.constant 0 : index
    %c0_8 = arith.constant 0 : index
    %15 = vector.load %arg4[%c0_7, %c0_8] : memref<128x256xbf16, #tpu.memory_space<vmem>>, vector<128x256xbf16>
    %cst_9 = arith.constant dense<0.000000e+00> : vector<16x256xf32>
    %16 = tpu.matmul %14, %15, %cst_9 {dimension_numbers = #tpu.dot_dimension_numbers<[1], [0], [0], [1], [0, 0, 1, 1], [], []>} : vector<16x128xbf16>, vector<128x256xbf16>, vector<16x256xf32> -> vector<16x256xf32>
    %17 = arith.addf %13, %16 : vector<16x256xf32>
    %cst_10 = arith.constant 0.000000e+00 : f32
    %18 = vector.broadcast %cst_10 : f32 to vector<16x256xf32>
    %19 = arith.cmpf ogt, %17, %18 : vector<16x256xf32>
    %cst_11 = arith.constant 2.000000e-01 : f32
    %20 = vector.broadcast %cst_11 : f32 to vector<16x256xf32>
    %21 = arith.mulf %20, %17 : vector<16x256xf32>
    %22 = arith.select %19, %17, %21 : vector<16x256xi1>, vector<16x256xf32>
    %23 = arith.truncf %22 : vector<16x256xf32> to vector<16x256xbf16>
    %c0_12 = arith.constant 0 : index
    %c0_13 = arith.constant 0 : index
    %24 = vector.load %arg5[%c0_12, %c0_13] : memref<256x256xbf16, #tpu.memory_space<vmem>>, vector<256x256xbf16>
    %cst_14 = arith.constant dense<0.000000e+00> : vector<16x256xf32>
    %25 = tpu.matmul %23, %24, %cst_14 {dimension_numbers = #tpu.dot_dimension_numbers<[1], [0], [0], [1], [0, 0, 1, 1], [], []>} : vector<16x256xbf16>, vector<256x256xbf16>, vector<16x256xf32> -> vector<16x256xf32>
    %c0_15 = arith.constant 0 : index
    %c0_16 = arith.constant 0 : index
    %26 = vector.load %arg6[%c0_15, %c0_16] : memref<1x256xf32, #tpu.memory_space<vmem>>, vector<1x256xf32>
    %27 = vector.broadcast %26 : vector<1x256xf32> to vector<16x256xf32>
    %28 = arith.addf %25, %27 : vector<16x256xf32>
    %cst_17 = arith.constant 0.000000e+00 : f32
    %29 = vector.broadcast %cst_17 : f32 to vector<16x256xf32>
    %30 = arith.cmpf ogt, %28, %29 : vector<16x256xf32>
    %cst_18 = arith.constant 2.000000e-01 : f32
    %31 = vector.broadcast %cst_18 : f32 to vector<16x256xf32>
    %32 = arith.mulf %31, %28 : vector<16x256xf32>
    %33 = arith.select %30, %28, %32 : vector<16x256xi1>, vector<16x256xf32>
    %c0_19 = arith.constant 0 : index
    %c0_20 = arith.constant 0 : index
    %34 = vector.load %arg7[%c0_19, %c0_20] : memref<1x256xf32, #tpu.memory_space<vmem>>, vector<1x256xf32>
    %35 = vector.broadcast %34 : vector<1x256xf32> to vector<16x256xf32>
    %36 = arith.mulf %33, %35 : vector<16x256xf32>
    %cst_21 = arith.constant dense<0.000000e+00> : vector<16xf32>
    %37 = vector.multi_reduction <add>, %36, %cst_21 [1] : vector<16x256xf32> to vector<16xf32>
    %38 = vector.shape_cast %37 : vector<16xf32> to vector<16x1xf32>
    %c0_22 = arith.constant 0 : index
    %c0_23 = arith.constant 0 : index
    %39 = memref.load %arg8[%c0_22, %c0_23] : memref<1x1xf32, #tpu.memory_space<smem>>
    %40 = vector.broadcast %39 : f32 to vector<16x1xf32>
    %41 = arith.addf %38, %40 : vector<16x1xf32>
    %c0_24 = arith.constant 0 : index
    %c0_25 = arith.constant 0 : index
    %42 = vector.load %arg9[%c0_24, %c0_25] : memref<16x1xf32, #tpu.memory_space<vmem>>, vector<16x1xf32>
    tpu.vector_store %arg9[%c0_24, %c0_25], %41 {strides = array<i32>} : memref<16x1xf32, #tpu.memory_space<vmem>>, vector<16x1xf32>,
    return
  }
  func.func @transform_0(%arg0: i32) -> (i32, i32) {
    %c0_i32 = arith.constant 0 : i32
    %c0_i32_0 = arith.constant 0 : i32
    return %arg0, %c0_i32 : i32, i32
  }
  func.func @transform_1(%arg0: i32) -> (i32, i32) {
    %c0_i32 = arith.constant 0 : i32
    %c0_i32_0 = arith.constant 0 : i32
    %c0_i32_1 = arith.constant 0 : i32
    return %c0_i32, %c0_i32_0 : i32, i32
  }
  func.func @transform_2(%arg0: i32) -> (i32, i32) {
    %c0_i32 = arith.constant 0 : i32
    %c0_i32_0 = arith.constant 0 : i32
    %c0_i32_1 = arith.constant 0 : i32
    return %c0_i32, %c0_i32_0 : i32, i32
  }
  func.func @transform_3(%arg0: i32) -> (i32, i32) {
    %c0_i32 = arith.constant 0 : i32
    %c0_i32_0 = arith.constant 0 : i32
    %c0_i32_1 = arith.constant 0 : i32
    return %c0_i32, %c0_i32_0 : i32, i32
  }
  func.func @transform_4(%arg0: i32) -> (i32, i32) {
    %c0_i32 = arith.constant 0 : i32
    %c0_i32_0 = arith.constant 0 : i32
    %c0_i32_1 = arith.constant 0 : i32
    return %c0_i32, %c0_i32_0 : i32, i32
  }
  func.func @transform_5(%arg0: i32) -> (i32, i32) {
    %c0_i32 = arith.constant 0 : i32
    %c0_i32_0 = arith.constant 0 : i32
    %c0_i32_1 = arith.constant 0 : i32
    return %c0_i32, %c0_i32_0 : i32, i32
  }
  func.func @transform_6(%arg0: i32) -> (i32, i32) {
    %c0_i32 = arith.constant 0 : i32
    %c0_i32_0 = arith.constant 0 : i32
    %c0_i32_1 = arith.constant 0 : i32
    return %c0_i32, %c0_i32_0 : i32, i32
  }
  func.func @transform_7(%arg0: i32) -> (i32, i32) {
    %c0_i32 = arith.constant 0 : i32
    %c0_i32_0 = arith.constant 0 : i32
    %c0_i32_1 = arith.constant 0 : i32
    return %c0_i32, %c0_i32_0 : i32, i32
  }
  func.func @transform_8(%arg0: i32) -> (i32, i32) {
    %c0_i32 = arith.constant 0 : i32
    %c0_i32_0 = arith.constant 0 : i32
    return %arg0, %c0_i32 : i32, i32
  }
}

</mosaic_0001>

<bundles_post_ra>
// kernel: discriminator_with_condition.1
= control target key start
LH: loop header
LB: loop body
LE: loop exit
PB: predicated region body
PF: predicated region fallthrough
CT: control target
= control target key end

     0   :  { %14 = vsyncpa [#allocation4], 0  ;;  %s1099_s0 = inlined_call_operand.vmem [shape: f32[8,48], index: 0, kind: input, shape index: {}]   ;;  %s1100_s1 = inlined_call_operand.hbm [shape: bf16[48,384], index: 1, kind: input, shape index: {}]   ;;  %s1101_s2 = inlined_call_operand.vmem [shape: f32[1,384], index: 2, kind: input, shape index: {}]   ;;  %s1102_s3 = inlined_call_operand.hbm [shape: bf16[128,256], index: 3, kind: input, shape index: {}]   ;;  %s1103_s4 = inlined_call_operand.hbm [shape: bf16[256,256], index: 4, kind: input, shape index: {}]   ;;  %s1104_s5 = inlined_call_operand.vmem [shape: f32[1,256], index: 5, kind: input, shape index: {}]   ;;  %s1105_s6 = inlined_call_operand.vmem [shape: f32[1,256], index: 6, kind: input, shape index: {}]   ;;  %s1106_s7 = inlined_call_operand.<no memory space> [shape: f32[1,1], index: 7, kind: input, shape index: {}]   ;;  %s1107_s8 = inlined_call_operand.vmem [shape: f32[8,1], index: 8, kind: output, shape index: {}]  }
   0x1   :  { %15 = vsyncpa [#allocation6], 0  ;;  %s979_s27 = smov [#allocation5]   ;;  %s909_s9 = scalar_lea.hbm %s1102_s3, 2048 }
   0x2   :  { %s37_s28 = sshll.u32 %s979_s27, 4  ;;  %p910_p0 = scmp.ne.s32.totalorder %s1102_s3, %s909_s9  ;;  %s38_s28 = int_to_ptr.vmem [resolvable:$true] %s37_s28 }
   0x3   :  { %p913_p1 = scmp.lt.u32.totalorder %s909_s9, %s1102_s3 }
   0x5   :  { %p915_p2 = pnand %p913_p1, %p910_p0 }
   0x7   :  { %918 = shalt.err (!%p915_p2)
}
   0x8   :  { %s919_s14 = scalar_lea.vmem %s38_s28, 2048  ;;  %p924_p4 = scmp.lt.s32.totalorder %s38_s28, %s38_s28 }
   0x9   :  { %p920_p3 = scmp.ne.s32.totalorder %s38_s28, %s919_s14  ;;  %p925_p5 = scmp.lt.s32.totalorder %s919_s14, %s919_s14 }
   0xb   :  { %p926_p6 = por %p925_p5, %p924_p4 }
   0xd   :  { %p927_p7 = pnand %p926_p6, %p920_p3 }
   0xf   :  { %930 = shalt.err (!%p927_p7)
}
  0x10   :  { %s980_s15 = smov 128   ;;  %s981_s16 = smov 8  }
  0x11   :  { %43 = dma.hbm_to_vmem [thread:$0]  %s1102_s3, 2048, %s38_s28, [#allocation6], %s980_s15, %s980_s15, %s981_s16  }
  0x12   :  { %s982_s19 = smov [#allocation3]   ;;  %s931_s23 = scalar_lea.hbm %s1100_s1, 1152 }
  0x13   :  { %s23_s20 = sshll.u32 %s982_s19, 4  ;;  %p932_p8 = scmp.ne.s32.totalorder %s1100_s1, %s931_s23  ;;  %s24_s20 = int_to_ptr.vmem [resolvable:$true] %s23_s20 }
  0x14   :  { %p935_p9 = scmp.lt.u32.totalorder %s931_s23, %s1100_s1 }
  0x16   :  { %p937_p10 = pnand %p935_p9, %p932_p8 }
  0x18   :  { %940 = shalt.err (!%p937_p10)
}
  0x19   :  { %s941_s29 = scalar_lea.vmem %s24_s20, 1152  ;;  %p946_p12 = scmp.lt.s32.totalorder %s24_s20, %s24_s20 }
  0x1a   :  { %p942_p11 = scmp.ne.s32.totalorder %s24_s20, %s941_s29  ;;  %p947_p13 = scmp.lt.s32.totalorder %s941_s29, %s941_s29 }
  0x1c   :  { %p948_p0 = por %p947_p13, %p946_p12 }
  0x1e   :  { %p949_p1 = pnand %p948_p0, %p942_p11 }
  0x20   :  { %952 = shalt.err (!%p949_p1)
}
  0x21   :  { %s983_s3 = smov 192   ;;  %s984_s28 = smov 12  }
  0x22   :  { %29 = dma.hbm_to_vmem [thread:$0]  %s1100_s1, 1152, %s24_s20, [#allocation4], %s983_s3, %s983_s3, %s984_s28  }
  0x23   :  { %s985_s10 = smov [#allocation7]   ;;  %s953_s14 = scalar_lea.hbm %s1103_s4, 4096 }
  0x24   :  { %s49_s11 = sshll.u32 %s985_s10, 4  ;;  %p954_p2 = scmp.ne.s32.totalorder %s1103_s4, %s953_s14  ;;  %s50_s11 = int_to_ptr.vmem [resolvable:$true] %s49_s11 }
  0x25   :  { %p957_p3 = scmp.lt.u32.totalorder %s953_s14, %s1103_s4 }
  0x27   :  { %p959_p4 = pnand %p957_p3, %p954_p2 }
  0x29   :  { %962 = shalt.err (!%p959_p4)
}
  0x2a   :  { %s963_s22 = scalar_lea.vmem %s50_s11, 4096  ;;  %p968_p6 = scmp.lt.s32.totalorder %s50_s11, %s50_s11 }
  0x2b   :  { %p964_p5 = scmp.ne.s32.totalorder %s50_s11, %s963_s22  ;;  %p969_p7 = scmp.lt.s32.totalorder %s963_s22, %s963_s22 }
  0x2d   :  { %p970_p8 = por %p969_p7, %p968_p6 }
  0x2f   :  { %p971_p9 = pnand %p970_p8, %p964_p5 }
  0x31   :  { %974 = shalt.err (!%p971_p9)
}
  0x32   :  { %55 = dma.hbm_to_vmem [thread:$0]  %s1103_s4, 4096, %s50_s11, [#allocation6], %s980_s15, %s980_s15, %s981_s16  }
  0x33   :  { %975 = dma.done.wait [#allocation4], 1152  }
  0x34   :  { %976 = vsyncadd [#allocation4], 4294966144 }
  0x35   :  { %977 = dma.done.wait [#allocation6], 6144  }
  0x36   :  { %978 = vsyncadd [#allocation6], 4294961152  ;;  %v986_v0 = vmov 0   ;;  %v825_v1 = vld [vmem:[#allocation3 + $0x4] ss:$12 sps:$4 sm:$0xff]   ;;  %v73_v8 = vld [vmem:[%s1099_s0 + $0x8] sm:$0xff]  ;;  %v89_v56 = vlaneseq }
  0x37   :  { %188 = vmatprep.mubr.bf16.mxu0 %v986_v0  ;;  %v827_v2 = vld [vmem:[#allocation3] ss:$12 sps:$4 sm:$0xff]   ;;  %156 = vmatprep.subr.bf16.mxu0 %v825_v1  ;;  %v828_v3 = vld [vmem:[#allocation3 + $0x1c] ss:$12 sps:$4 sm:$0xff]   ;;  %v830_v4 = vld [vmem:[#allocation3 + $0x18] ss:$12 sps:$4 sm:$0xff]  }
  0x38   :  { %157 = vmatpush1.bf16.msra.mxu0 %v827_v2  ;;  %v831_v5 = vld [vmem:[#allocation3 + $0x34] ss:$12 sps:$4 sm:$0xff]   ;;  %v833_v6 = vld [vmem:[#allocation3 + $0x30] ss:$12 sps:$4 sm:$0xff]   ;;  %vm152_vm0 = vcmask 392192   ;;  %v987_v11 = vmov 0.0  }
  0x39   :  { %158 = vmatprep.subr.bf16.mxu0 %v828_v3  ;;  %v72_v7 = vld [vmem:[%s1099_s0] sm:$0xff]  ;;  %v834_v10 = vld [vmem:[#allocation3 + $0x8] ss:$12 sps:$4 sm:$0xff]   ;;  %vm988_vm1 = vmmov 0   ;;  %v90_v57 = vshrl.u32 %v89_v56, 7  ;;  %vm689_vm12 = vcmask 7168  }
  0x3a   :  { %v74_v9 = vpack.c.bf16 %v73_v8, %v72_v7  ;;  %v835_v12 = vld [vmem:[#allocation3 + $0x20] ss:$12 sps:$4 sm:$0xff]   ;;  %v836_v13 = vld [vmem:[#allocation3 + $0x38] ss:$12 sps:$4 sm:$0xff]   ;;  %v837_v15 = vld [vmem:[#allocation5] ss:$8 sps:$4 sm:$0xff]  }
  0x3b   :  { %v839_v14 = vld [vmem:[#allocation5 + $0x4] ss:$8 sps:$4 sm:$0xff]   ;;  %v842_v16 = vld [vmem:[#allocation5 + $0x14] ss:$8 sps:$4 sm:$0xff]   ;;  %v840_v17 = vld [vmem:[#allocation5 + $0x10] ss:$8 sps:$4 sm:$0xff]  }
  0x3c   :  { %159 = vmatpush1.bf16.msra.mxu0 %v830_v4  ;;  %v845_v18 = vld [vmem:[#allocation5 + $0x24] ss:$8 sps:$4 sm:$0xff]   ;;  %v843_v19 = vld [vmem:[#allocation5 + $0x20] ss:$8 sps:$4 sm:$0xff]   ;;  %v848_v20 = vld [vmem:[#allocation5 + $0x34] ss:$8 sps:$4 sm:$0xff]  }
  0x3d   :  { %160 = vmatprep.subr.bf16.mxu0 %v831_v5  ;;  %v846_v21 = vld [vmem:[#allocation5 + $0x30] ss:$8 sps:$4 sm:$0xff]   ;;  %v851_v22 = vld [vmem:[#allocation5 + $0x44] ss:$8 sps:$4 sm:$0xff]   ;;  %v849_v23 = vld [vmem:[#allocation5 + $0x40] ss:$8 sps:$4 sm:$0xff]  }
  0x3e   :  { %v854_v24 = vld [vmem:[#allocation5 + $0x54] ss:$8 sps:$4 sm:$0xff]   ;;  %v852_v25 = vld [vmem:[#allocation5 + $0x50] ss:$8 sps:$4 sm:$0xff]   ;;  %v857_v26 = vld [vmem:[#allocation5 + $0x64] ss:$8 sps:$4 sm:$0xff]  }
  0x3f   :  { %v855_v27 = vld [vmem:[#allocation5 + $0x60] ss:$8 sps:$4 sm:$0xff]   ;;  %v860_v28 = vld [vmem:[#allocation5 + $0x74] ss:$8 sps:$4 sm:$0xff]   ;;  %v858_v29 = vld [vmem:[#allocation5 + $0x70] ss:$8 sps:$4 sm:$0xff]  }
  0x40   :  { %161 = vmatpush1.bf16.msra.mxu0 %v833_v6  ;;  %v861_v30 = vld [vmem:[#allocation7 + $0x4] ss:$8 sps:$4 sm:$0xff]   ;;  %v863_v31 = vld [vmem:[#allocation7] ss:$8 sps:$4 sm:$0xff]   ;;  %v864_v32 = vld [vmem:[#allocation7 + $0x14] ss:$8 sps:$4 sm:$0xff]  }
  0x41   :  { %797 = vmatprep.subr.bf16.mxu0 %v987_v11  ;;  %608 = vmatprep.subr.bf16.mxu1 %v861_v30  ;;  %v866_v33 = vld [vmem:[#allocation7 + $0x10] ss:$8 sps:$4 sm:$0xff]   ;;  %v867_v34 = vld [vmem:[#allocation7 + $0x24] ss:$8 sps:$4 sm:$0xff]   ;;  %v869_v35 = vld [vmem:[#allocation7 + $0x20] ss:$8 sps:$4 sm:$0xff]  }
  0x42   :  { %609 = vmatpush1.bf16.msra.mxu1 %v863_v31  ;;  %v870_v36 = vld [vmem:[#allocation7 + $0x34] ss:$8 sps:$4 sm:$0xff]   ;;  %v872_v37 = vld [vmem:[#allocation7 + $0x30] ss:$8 sps:$4 sm:$0xff]   ;;  %v873_v38 = vld [vmem:[#allocation7 + $0x44] ss:$8 sps:$4 sm:$0xff]  }
  0x43   :  { %743 = vmatmul.mubr.msk.bf16.vlgmr.msra.gmra.mrb[0].mxu0 %vm152_vm0, %v74_v9  ;;  %610 = vmatprep.subr.bf16.mxu1 %v864_v32  ;;  %v875_v39 = vld [vmem:[#allocation7 + $0x40] ss:$8 sps:$4 sm:$0xff]   ;;  %v876_v40 = vld [vmem:[#allocation7 + $0x54] ss:$8 sps:$4 sm:$0xff]   ;;  %v878_v41 = vld [vmem:[#allocation7 + $0x50] ss:$8 sps:$4 sm:$0xff]  }
  0x44   :  { %798 = vmatpush3.bf16.msra.mxu0 %v834_v10  ;;  %803 = vmatprep.mubr.msk.bf16.mxu0 %vm988_vm1, %v987_v11  ;;  %v879_v42 = vld [vmem:[#allocation7 + $0x64] ss:$8 sps:$4 sm:$0xff]   ;;  %v881_v43 = vld [vmem:[#allocation7 + $0x60] ss:$8 sps:$4 sm:$0xff]   ;;  %v882_v44 = vld [vmem:[#allocation7 + $0x74] ss:$8 sps:$4 sm:$0xff]  }
  0x45   :  { %799 = vmatprep.subr.bf16.mxu0 %v987_v11  ;;  %v884_v45 = vld [vmem:[#allocation7 + $0x70] ss:$8 sps:$4 sm:$0xff]   ;;  %v885_v46 = vld [vmem:[#allocation7 + $0x84] ss:$8 sps:$4 sm:$0xff]   ;;  %v887_v47 = vld [vmem:[#allocation7 + $0x80] ss:$8 sps:$4 sm:$0xff]  }
  0x46   :  { %611 = vmatpush1.bf16.msra.mxu1 %v866_v33  ;;  %v888_v48 = vld [vmem:[#allocation7 + $0x94] ss:$8 sps:$4 sm:$0xff]   ;;  %v890_v49 = vld [vmem:[#allocation7 + $0x90] ss:$8 sps:$4 sm:$0xff]   ;;  %v891_v50 = vld [vmem:[#allocation7 + $0xa4] ss:$8 sps:$4 sm:$0xff]  }
  0x47   :  { %612 = vmatprep.subr.bf16.mxu1 %v867_v34  ;;  %v893_v51 = vld [vmem:[#allocation7 + $0xa0] ss:$8 sps:$4 sm:$0xff]   ;;  %v894_v52 = vld [vmem:[#allocation7 + $0xb4] ss:$8 sps:$4 sm:$0xff]   ;;  %v896_v53 = vld [vmem:[#allocation7 + $0xb0] ss:$8 sps:$4 sm:$0xff]  }
  0x48   :  { %800 = vmatpush3.bf16.msra.mxu0 %v835_v12  ;;  %v897_v54 = vld [vmem:[#allocation7 + $0xc4] ss:$8 sps:$4 sm:$0xff]   ;;  %v899_v55 = vld [vmem:[#allocation7 + $0xc0] ss:$8 sps:$4 sm:$0xff]   ;;  %v99_v58 = vsub.s32 2, %v90_v57 }
  0x49   :  { %801 = vmatprep.subr.bf16.mxu0 %v987_v11  ;;  %v87_v59 = vld [vmem:[%s1101_s2] sm:$0x7]  ;;  %v900_v8 = vld [vmem:[#allocation7 + $0xd4] ss:$8 sps:$4 sm:$0xff]   ;;  %v903_v10 = vld [vmem:[#allocation7 + $0xe4] ss:$8 sps:$4 sm:$0xff]  }
  0x4a   :  { %613 = vmatpush1.bf16.msra.mxu1 %v869_v35  ;;  %v100_v60 = vrot.slane %v87_v59, %v99_v58  ;;  %v905_v11 = vld [vmem:[#allocation7 + $0xe0] ss:$8 sps:$4 sm:$0xff]   ;;  %v906_v12 = vld [vmem:[#allocation7 + $0xf4] ss:$8 sps:$4 sm:$0xff]  }
  0x4b   :  { %614 = vmatprep.subr.bf16.mxu1 %v870_v36  ;;  %v436_v36 = vld [vmem:[%s1104_s5] sm:$0x3] }
  0x4c   :  { %802 = vmatpush3.bf16.msra.mxu0 %v836_v13  ;;  %v908_v13 = vld [vmem:[#allocation7 + $0xf0] ss:$8 sps:$4 sm:$0xff]  }
  0x4d   :  { %343 = vmatprep.subr.bf16.mxu0 %v839_v14  ;;  %v91_v14 = vsub.s32 0, %v90_v57 }
  0x4e   :  { %615 = vmatpush1.bf16.msra.mxu1 %v872_v37 }
  0x4f   :  { %804 = vmatmul.mubr.msk.bf16.vlgmr.msra.gmra.mrb[4].mxu0 %vm152_vm0, %v74_v9  ;;  %616 = vmatprep.subr.bf16.mxu1 %v873_v38  ;;  %v902_v9 = vld [vmem:[#allocation7 + $0xd0] ss:$8 sps:$4 sm:$0xff]   ;;  %v441_v37 = vrot.slane %v436_v36, %v91_v14 }
  0x50   :  { %344 = vmatpush1.bf16.msra.mxu0 %v837_v15  ;;  %375 = vmatprep.mubr.bf16.mxu0 %v986_v0  ;;  %v95_v15 = vsub.s32 1, %v90_v57 }
  0x51   :  { %345 = vmatprep.subr.bf16.mxu0 %v842_v16  ;;  %v92_v16 = vrot.slane %v87_v59, %v91_v14 }
  0x52   :  { %617 = vmatpush1.bf16.msra.mxu1 %v875_v39  ;;  %v445_v38 = vrot.slane %v436_v36, %v95_v15  ;;  %v663_v39 = vld [vmem:[%s1105_s6] sm:$0x3] }
  0x53   :  { %618 = vmatprep.subr.bf16.mxu1 %v876_v40 }
  0x54   :  { %346 = vmatpush1.bf16.msra.mxu0 %v840_v17  ;;  %v96_v17 = vrot.slane %v87_v59, %v95_v15 }
  0x55   :  { %347 = vmatprep.subr.bf16.mxu0 %v845_v18 }
  0x56   :  { %619 = vmatpush1.bf16.msra.mxu1 %v878_v41 }
  0x57   :  { %620 = vmatprep.subr.bf16.mxu1 %v879_v42 }
  0x58   :  { %348 = vmatpush1.bf16.msra.mxu0 %v843_v19 }
  0x59   :  { %349 = vmatprep.subr.bf16.mxu0 %v848_v20 }
  0x5a   :  { %621 = vmatpush1.bf16.msra.mxu1 %v881_v43 }
  0x5b   :  { %622 = vmatprep.subr.bf16.mxu1 %v882_v44 }
  0x5c   :  { %350 = vmatpush1.bf16.msra.mxu0 %v846_v21 }
  0x5d   :  { %351 = vmatprep.subr.bf16.mxu0 %v851_v22 }
  0x5e   :  { %623 = vmatpush1.bf16.msra.mxu1 %v884_v45  ;;  %v668_v45 = vrot.slane %v663_v39, %v91_v14 }
  0x5f   :  { %624 = vmatprep.subr.bf16.mxu1 %v885_v46 }
  0x60   :  { %352 = vmatpush1.bf16.msra.mxu0 %v849_v23 }
  0x61   :  { %353 = vmatprep.subr.bf16.mxu0 %v854_v24 }
  0x62   :  { %625 = vmatpush1.bf16.msra.mxu1 %v887_v47 }
  0x63   :  { %626 = vmatprep.subr.bf16.mxu1 %v888_v48 }
  0x64   :  { %354 = vmatpush1.bf16.msra.mxu0 %v852_v25 }
  0x65   :  { %355 = vmatprep.subr.bf16.mxu0 %v857_v26 }
  0x66   :  { %627 = vmatpush1.bf16.msra.mxu1 %v890_v49  ;;  %v672_v49 = vrot.slane %v663_v39, %v95_v15 }
  0x67   :  { %628 = vmatprep.subr.bf16.mxu1 %v891_v50 }
  0x68   :  { %356 = vmatpush1.bf16.msra.mxu0 %v855_v27 }
  0x69   :  { %357 = vmatprep.subr.bf16.mxu0 %v860_v28 }
  0x6a   :  { %629 = vmatpush1.bf16.msra.mxu1 %v893_v51 }
  0x6b   :  { %630 = vmatprep.subr.bf16.mxu1 %v894_v52 }
  0x6c   :  { %358 = vmatpush1.bf16.msra.mxu0 %v858_v29 }
  0x6e   :  { %631 = vmatpush1.bf16.msra.mxu1 %v896_v53 }
  0x6f   :  { %632 = vmatprep.subr.bf16.mxu1 %v897_v54 }
  0x72   :  { %633 = vmatpush1.bf16.msra.mxu1 %v899_v55 }
  0x73   :  { %634 = vmatprep.subr.bf16.mxu1 %v900_v8 }
  0x76   :  { %635 = vmatpush1.bf16.msra.mxu1 %v902_v9 }
  0x77   :  { %636 = vmatprep.subr.bf16.mxu1 %v903_v10 }
  0x7a   :  { %637 = vmatpush1.bf16.msra.mxu1 %v905_v11 }
  0x7b   :  { %638 = vmatprep.subr.bf16.mxu1 %v906_v12 }
  0x7e   :  { %639 = vmatpush1.bf16.msra.mxu1 %v908_v13 }
 0x122   :  { %v233_v61 = vpop.f32.mrb[4].mxu0 }
 0x123   :  { %v234_v62 = vadd.f32 %v233_v61, %v100_v60  ;;  %v805_v63 = vpop.f32.mrb[5].mxu0 }
 0x124   :  { %v236_v0 = vpop.f32.mrb[6].mxu0 }
 0x125   :  { %v242_v1 = vmul.f32 0.2, %v234_v62  ;;  %v237_v2 = vadd.f32 %v236_v0, %v100_v60  ;;  %v806_v3 = vpop.f32.mrb[7].mxu0  ;;  %vm240_vm2 = vcmp.gt.f32.partialorder %v234_v62, 0.0  ;;  %v686_v0 = vstv %s1106_s7 }
 0x127   :  { %vm241_vm3 = vcmp.gt.f32.partialorder %v237_v2, 0.0  ;;  %v243_v4 = vmul.f32 0.2, %v237_v2  ;;  %v244_v5 = vsel %vm240_vm2, %v234_v62, %v242_v1 }
 0x129   :  { %v245_v6 = vsel %vm241_vm3, %v237_v2, %v243_v4 }
 0x12a   :  { %v246_v7 = vpack.c.bf16 %v245_v6, %v244_v5 }
 0x12c   :  { %376 = vmatmul.mubr.bf16.vlgmr.msra.gmra.mrb[0].mxu0 %v246_v7 }
 0x1ff   :  { %v377_v18 = vpop.f32.mrb[0].mxu0 }
 0x200   :  { %v807_v19 = vadd.f32 %v377_v18, %v92_v16  ;;  %v379_v20 = vpop.f32.mrb[1].mxu0 }
 0x201   :  { %v808_v21 = vadd.f32 %v379_v20, %v96_v17  ;;  %v381_v22 = vpop.f32.mrb[2].mxu0 }
 0x202   :  { %v394_v23 = vmul.f32 0.2, %v807_v19  ;;  %v809_v24 = vadd.f32 %v381_v22, %v92_v16  ;;  %v383_v25 = vpop.f32.mrb[3].mxu0  ;;  %vm390_vm4 = vcmp.gt.f32.partialorder %v807_v19, 0.0 }
 0x203   :  { %v395_v26 = vmul.f32 0.2, %v808_v21  ;;  %v810_v27 = vadd.f32 %v383_v25, %v96_v17  ;;  %vm391_vm6 = vcmp.gt.f32.partialorder %v808_v21, 0.0 }
 0x204   :  { %vm392_vm5 = vcmp.gt.f32.partialorder %v809_v24, 0.0  ;;  %v396_v28 = vmul.f32 0.2, %v809_v24  ;;  %v398_v30 = vsel %vm390_vm4, %v807_v19, %v394_v23 }
 0x205   :  { %v397_v29 = vmul.f32 0.2, %v810_v27  ;;  %vm393_vm7 = vcmp.gt.f32.partialorder %v810_v27, 0.0  ;;  %v399_v32 = vsel %vm391_vm6, %v808_v21, %v395_v26 }
 0x206   :  { %v400_v31 = vsel %vm392_vm5, %v809_v24, %v396_v28 }
 0x207   :  { %v401_v33 = vsel %vm393_vm7, %v810_v27, %v397_v29  ;;  %v402_v34 = vpack.c.bf16 %v400_v31, %v398_v30 }
 0x208   :  { %v403_v35 = vpack.c.bf16 %v401_v33, %v399_v32 }
 0x20a   :  { %640 = vmatprep.mubr.bf16.mxu1 %v403_v35 }
 0x20b   :  { %641 = vmatmul.mubr.bf16.vlgmr.msra.gmra.mrb[0].mxu1 %v402_v34 }
 0x2de   :  { %v642_v40 = vpop.f32.mrb[0].mxu1 }
 0x2df   :  { %v643_v41 = vadd.f32 %v642_v40, %v441_v37  ;;  %v644_v42 = vpop.f32.mrb[1].mxu1 }
 0x2e0   :  { %v645_v43 = vadd.f32 %v644_v42, %v445_v38  ;;  %v646_v44 = vpop.f32.mrb[2].mxu1 }
 0x2e1   :  { %vm651_vm8 = vcmp.gt.f32.partialorder %v643_v41, 0.0  ;;  %v655_v46 = vmul.f32 0.2, %v643_v41  ;;  %v647_v47 = vadd.f32 %v646_v44, %v441_v37  ;;  %v648_v48 = vpop.f32.mrb[3].mxu1 }
 0x2e2   :  { %vm652_vm9 = vcmp.gt.f32.partialorder %v645_v43, 0.0  ;;  %v656_v50 = vmul.f32 0.2, %v645_v43  ;;  %v649_v51 = vadd.f32 %v648_v48, %v445_v38 }
 0x2e3   :  { %vm653_vm10 = vcmp.gt.f32.partialorder %v647_v47, 0.0  ;;  %v657_v52 = vmul.f32 0.2, %v647_v47  ;;  %v659_v53 = vsel %vm651_vm8, %v643_v41, %v655_v46 }
 0x2e4   :  { %vm654_vm11 = vcmp.gt.f32.partialorder %v649_v51, 0.0  ;;  %v658_v54 = vmul.f32 0.2, %v649_v51  ;;  %v660_v55 = vsel %vm652_vm9, %v645_v43, %v656_v50  ;;  %v675_v56 = vmul.f32 %v668_v45, %v659_v53 }
 0x2e5   :  { %v676_v57 = vmul.f32 %v672_v49, %v660_v55  ;;  %v661_v58 = vsel %vm653_vm10, %v647_v47, %v657_v52 }
 0x2e6   :  { %v662_v59 = vsel %vm654_vm11, %v649_v51, %v658_v54  ;;  %v677_v60 = vmul.f32 %v668_v45, %v661_v58 }
 0x2e7   :  { %v679_v61 = vadd.f32 %v676_v57, %v675_v56  ;;  %v678_v62 = vmul.f32 %v672_v49, %v662_v59 }
 0x2e9   :  { %680 = vadd.xlane.f32.xlu0 %v679_v61  ;;  %v682_v63 = vadd.f32 %v678_v62, %v677_v60 }
 0x2ed   :  { %683 = vadd.xlane.f32.xlu0 %v682_v63 }
 0x376   :  { %v681_v1 = vpop.xlane.xlu0 %680 }
 0x377   :  { %v687_v2 = vadd.f32 %v686_v0, %v681_v1 }
 0x379   :  { %690 = vst.msk [vmem:[#allocation8] sm:$0xff] %vm689_vm12, %v687_v2 }
 0x37a   :  { %v684_v3 = vpop.xlane.xlu0 %683 }
 0x380   :  { %v721_v4 = vld [vmem:[#allocation8] sm:$0xff] }
 0x381   :  { %722 = vst [vmem:[%s1107_s8] sm:$0xff] %v721_v4 }
 0x382   :  { %728 = vsyncpa [#allocation4], 1 }
 0x383   :  { %729 = vsyncpa [#allocation6], 1 }

</bundles_post_ra>
